<compile_context>
chip_gen: v5e
topology: v5e:2x2
jax: 0.10.0
libtpu: 0.0.40
codegen_flags: <defaults>
</compile_context>

<pallas_src>
import functools

import jax
import jax.numpy as jnp
from jax.experimental import pallas as pl
from jax.experimental.pallas import tpu as pltpu


def _round_up(x, m):
    return (x + m - 1) // m * m


def _choose_row_tile(m, cap, align):
    """Largest TM <= cap that is a multiple of `align` and (preferably) divides m."""
    cap = max(align, (cap // align) * align)
    top = min(cap, _round_up(m, align))
    for tm in range(top, 0, -align):
        if m % tm == 0:
            return tm, m                     # exact tiling, no row padding
    tm = top
    return tm, _round_up(m, tm)              # fall back to padded rows


def camhead_kernel(x_ref,                    # (TM, Dp)  compute dtype
                   wa_ref, ba_ref,           # fused [w1 | wc]: (Dp, Na), (1, Na)
                   w2_ref, b2_ref,           # (Dp, Dp), (1, Dp)
                   w3_ref, b3_ref,           # (Dp, 8),  (1, 8)
                   out_ref,                  # (TM, 16) f32
                   *, hid_w, logit_off):
    x = x_ref[...]

    # Fused matmul #1: [specific_embed layer-1 | class_embed] in one MXU pass.
    z = jnp.dot(x, wa_ref[...], preferred_element_type=jnp.float32) + ba_ref[...]
    logits = z[:, logit_off:logit_off + 2]            # class_embed output
    # ReLU in f32.  When the class columns live inside the D->Dp padding they
    # also pass through here, but the matching rows of w2 are zero, so they
    # cannot contaminate layer 2.
    h = jnp.maximum(z[:, :hid_w], 0.0).astype(w2_ref.dtype)

    # specific_embed layer 2 (+ReLU) and layer 3 (no activation).
    h = jnp.dot(h, w2_ref[...], preferred_element_type=jnp.float32) + b2_ref[...]
    h = jnp.maximum(h, 0.0).astype(w3_ref.dtype)
    curves = jnp.dot(h, w3_ref[...], preferred_element_type=jnp.float32) + b3_ref[...]

    # Single full-width store: [logits(2) | curves(8) | zeros(6)].
    pad = jnp.zeros((logits.shape[0], 6), jnp.float32)
    out_ref[...] = jnp.concatenate([logits, curves, pad], axis=-1)


def pack_cam_head_params(params, compute_dtype=jnp.bfloat16):
    """One-time weight packing (call outside the per-step path)."""
    f32 = jnp.float32
    D = params["w1"].shape[0]
    Dp = _round_up(D, 128)
    if Dp - D >= 2:
        Na, logit_off = Dp, D           # class columns ride in the existing padding
    else:
        Na, logit_off = Dp + 128, Dp    # D is a 128 multiple: one extra N pass

    wa = jnp.zeros((Dp, Na), f32)
    wa = wa.at[:D, :D].set(params["w1"].astype(f32))
    wa = wa.at[:D, logit_off:logit_off + 2].set(params["wc"].astype(f32))
    ba = jnp.zeros((1, Na), f32)
    ba = ba.at[:, :D].set(params["b1"].astype(f32).reshape(1, D))
    ba = ba.at[:, logit_off:logit_off + 2].set(params["bc"].astype(f32).reshape(1, 2))
    w2 = jnp.zeros((Dp, Dp), f32).at[:D, :D].set(params["w2"].astype(f32))
    b2 = jnp.zeros((1, Dp), f32).at[:, :D].set(params["b2"].astype(f32).reshape(1, D))
    w3 = jnp.zeros((Dp, 8), f32).at[:D, :].set(params["w3"].astype(f32))
    b3 = params["b3"].astype(f32).reshape(1, 8)

    return {
        "wa": wa.astype(compute_dtype), "ba": ba,
        "w2": w2.astype(compute_dtype), "b2": b2,
        "w3": w3.astype(compute_dtype), "b3": b3,
    }


@functools.partial(jax.jit, static_argnames=("block_rows",))
def cam_head_forward(hs, packed, *, block_rows=2048):
    """hs: (L, B, Q, D).  packed: output of pack_cam_head_params."""
    L, B, Q, D = hs.shape
    M = L * B * Q
    compute_dtype = packed["wa"].dtype
    Dp = packed["w2"].shape[0]
    Na = packed["wa"].shape[1]
    logit_off = D if Na == Dp else Dp

    # bf16 packs 2 rows/sublane -> multiple-of-16 row tiles; prefer a TM that
    # divides M (no row padding, even grid count for v7x megacore sharding).
    row_align = 16 if jnp.dtype(compute_dtype).itemsize < 4 else 8
    TM, Mp = _choose_row_tile(M, block_rows, row_align)

    # Cast directly to the compute dtype (no f32 intermediate); pad only if needed.
    x = hs.reshape(M, D).astype(compute_dtype)
    if Mp != M or Dp != D:
        x = jnp.pad(x, ((0, Mp - M), (0, Dp - D)))

    grid = (Mp // TM,)
    wbytes = jnp.dtype(compute_dtype).itemsize
    flops = 2 * Mp * Dp * (Na + Dp + 8)
    bytes_accessed = (Mp * Dp * wbytes                          # x
                      + (Dp * Na + Dp * Dp + Dp * 8) * wbytes   # weights
                      + (Na + Dp + 8) * 4                       # biases
                      + Mp * 16 * 4)                            # packed output

    def _resident(shape):
        # Constant index_map across the grid -> single-buffered resident weight.
        return pl.BlockSpec(shape, lambda i: (0, 0), pipeline_mode=pl.Buffered(1))

    packed_out = pl.pallas_call(
        functools.partial(camhead_kernel, hid_w=Dp, logit_off=logit_off),
        out_shape=jax.ShapeDtypeStruct((Mp, 16), jnp.float32),
        grid=grid,
        in_specs=[
            pl.BlockSpec((TM, Dp), lambda i: (i, 0)),   # x: row tiles, pipelined DMA
            _resident((Dp, Na)), _resident((1, Na)),    # fused [w1|wc] + bias
            _resident((Dp, Dp)), _resident((1, Dp)),    # layer 2
            _resident((Dp, 8)), _resident((1, 8)),      # layer 3
        ],
        out_specs=pl.BlockSpec((TM, 16), lambda i: (i, 0)),
        compiler_params=pltpu.CompilerParams(
            dimension_semantics=("parallel",),          # megacore sharding on v7x
            vmem_limit_bytes=48 * 1024 * 1024,
        ),
        cost_estimate=pl.CostEstimate(flops=flops, transcendentals=0,
                                      bytes_accessed=bytes_accessed),
    )(x, packed["wa"], packed["ba"], packed["w2"], packed["b2"],
      packed["w3"], packed["b3"])

    packed_out = packed_out[:M]
    output_class = packed_out[:, 0:2].reshape(L, B, Q, 2)
    output_specific = packed_out[:, 2:10].reshape(L, B, Q, 8)

    return {
        "pred_logits": output_class[-1],
        "pred_curves": output_specific[-1],
        # aux_loss = True in the module:
        "aux_outputs": [
            {"pred_logits": output_class[i], "pred_curves": output_specific[i]}
            for i in range(L - 1)
        ],
    }


def _reference_forward(hs, params):
    """Pure-JAX f32 reference for correctness checking."""
    x = hs.astype(jnp.float32)
    logits = x @ params["wc"] + params["bc"]
    h = jnp.maximum(x @ params["w1"] + params["b1"], 0.0)
    h = jnp.maximum(h @ params["w2"] + params["b2"], 0.0)
    curves = h @ params["w3"] + params["b3"]
    return logits, curves


def make_params(key, hidden_dim, num_cls=2, out_dim=8):
    ks = jax.random.split(key, 8)
    s = 0.02
    return {
        "wc": s * jax.random.normal(ks[0], (hidden_dim, num_cls), jnp.float32),
        "bc": s * jax.random.normal(ks[1], (1, num_cls), jnp.float32),
        "w1": s * jax.random.normal(ks[2], (hidden_dim, hidden_dim), jnp.float32),
        "b1": s * jax.random.normal(ks[3], (1, hidden_dim), jnp.float32),
        "w2": s * jax.random.normal(ks[4], (hidden_dim, hidden_dim), jnp.float32),
        "b2": s * jax.random.normal(ks[5], (1, hidden_dim), jnp.float32),
        "w3": s * jax.random.normal(ks[6], (hidden_dim, out_dim), jnp.float32),
        "b3": s * jax.random.normal(ks[7], (1, out_dim), jnp.float32),
    }


def _check(out, ref_logits, ref_curves, atol, rtol):
    assert jnp.allclose(out["pred_logits"], ref_logits[-1], atol=atol, rtol=rtol)
    assert jnp.allclose(out["pred_curves"], ref_curves[-1], atol=atol, rtol=rtol)
    for i, aux in enumerate(out["aux_outputs"]):
        assert jnp.allclose(aux["pred_logits"], ref_logits[i], atol=atol, rtol=rtol)
        assert jnp.allclose(aux["pred_curves"], ref_curves[i], atol=atol, rtol=rtol)


if __name__ == "__main__":
    key = jax.random.PRNGKey(0)
    k_hs, k_p = jax.random.split(key)

    # Small shapes consistent with the module: L decoder layers, batch, queries, hidden.
    # (At these toy sizes a custom kernel is pure overhead; it pays off at
    #  production DETR sizes, e.g. L=6, B=32, Q=100, D=256.)
    L, B, Q, D = 4, 2, 8, 32
    hs = jax.random.normal(k_hs, (L, B, Q, D), jnp.float32)
    params = make_params(k_p, hidden_dim=D)

    ref_logits, ref_curves = _reference_forward(hs, params)
    ref_logits = ref_logits.reshape(L, B, Q, 2)
    ref_curves = ref_curves.reshape(L, B, Q, 8)

    # f32 compute path: tight tolerance against the reference.
    packed_f32 = pack_cam_head_params(params, compute_dtype=jnp.float32)
    out_f32 = cam_head_forward(hs, packed_f32)
    jax.block_until_ready(out_f32["pred_logits"])
    _check(out_f32, ref_logits, ref_curves, atol=1e-5, rtol=1e-5)

    # Default bf16-MXU path (f32 accumulation): relaxed tolerance.
    packed_bf16 = pack_cam_head_params(params, compute_dtype=jnp.bfloat16)
    out = cam_head_forward(hs, packed_bf16)
    jax.block_until_ready(out["pred_logits"])
    jax.block_until_ready(out["pred_curves"])
    _check(out, ref_logits, ref_curves, atol=1e-2, rtol=1e-2)

    print("KERNEL_OK")
</pallas_src>

<mosaic_0001>
module attributes {stable_mosaic.version = 11 : i64} {
  func.func @camhead_kernel(%arg0: i32, %arg1: memref<64x128xf32, #tpu.memory_space<vmem>>, %arg2: memref<128x128xf32, #tpu.memory_space<vmem>>, %arg3: memref<1x128xf32, #tpu.memory_space<vmem>>, %arg4: memref<128x128xf32, #tpu.memory_space<vmem>>, %arg5: memref<1x128xf32, #tpu.memory_space<vmem>>, %arg6: memref<128x8xf32, #tpu.memory_space<vmem>>, %arg7: memref<1x8xf32, #tpu.memory_space<vmem>>, %arg8: memref<64x16xf32, #tpu.memory_space<vmem>>) attributes {dimension_semantics = [#tpu.dimension_semantics<parallel>], iteration_bounds = array<i64: 1>, scalar_prefetch = 0 : i64, scratch_operands = 0 : i64, tpu.core_type = #tpu.core_type<tc>, window_params = [{transform_indices = @transform_0, window_bounds = array<i64: 64, 128>}, {pipeline_mode = #tpu.pipeline_mode<synchronous>, transform_indices = @transform_1, window_bounds = array<i64: 128, 128>}, {pipeline_mode = #tpu.pipeline_mode<synchronous>, transform_indices = @transform_2, window_bounds = array<i64: 1, 128>}, {pipeline_mode = #tpu.pipeline_mode<synchronous>, transform_indices = @transform_3, window_bounds = array<i64: 128, 128>}, {pipeline_mode = #tpu.pipeline_mode<synchronous>, transform_indices = @transform_4, window_bounds = array<i64: 1, 128>}, {pipeline_mode = #tpu.pipeline_mode<synchronous>, transform_indices = @transform_5, window_bounds = array<i64: 128, 8>}, {pipeline_mode = #tpu.pipeline_mode<synchronous>, transform_indices = @transform_6, window_bounds = array<i64: 1, 8>}, {transform_indices = @transform_7, window_bounds = array<i64: 64, 16>}]} {
    %c0 = arith.constant 0 : index
    %c0_0 = arith.constant 0 : index
    %0 = vector.load %arg1[%c0, %c0_0] : memref<64x128xf32, #tpu.memory_space<vmem>>, vector<64x128xf32>
    %c0_1 = arith.constant 0 : index
    %c0_2 = arith.constant 0 : index
    %1 = vector.load %arg2[%c0_1, %c0_2] : memref<128x128xf32, #tpu.memory_space<vmem>>, vector<128x128xf32>
    %cst = arith.constant dense<0.000000e+00> : vector<64x128xf32>
    %2 = tpu.matmul %0, %1, %cst {dimension_numbers = #tpu.dot_dimension_numbers<[1], [0], [0], [1], [0, 0, 1, 1], [], []>} : vector<64x128xf32>, vector<128x128xf32>, vector<64x128xf32> -> vector<64x128xf32>
    %c0_3 = arith.constant 0 : index
    %c0_4 = arith.constant 0 : index
    %3 = vector.load %arg3[%c0_3, %c0_4] : memref<1x128xf32, #tpu.memory_space<vmem>>, vector<1x128xf32>
    %4 = vector.broadcast %3 : vector<1x128xf32> to vector<64x128xf32>
    %5 = arith.addf %2, %4 : vector<64x128xf32>
    %6 = vector.extract_strided_slice %5 {offsets = [0, 32], sizes = [64, 2], strides = [1, 1]} : vector<64x128xf32> to vector<64x2xf32>
    %cst_5 = arith.constant 0.000000e+00 : f32
    %7 = vector.broadcast %cst_5 : f32 to vector<64x128xf32>
    %8 = arith.maximumf %5, %7 : vector<64x128xf32>
    %c0_6 = arith.constant 0 : index
    %c0_7 = arith.constant 0 : index
    %9 = vector.load %arg4[%c0_6, %c0_7] : memref<128x128xf32, #tpu.memory_space<vmem>>, vector<128x128xf32>
    %cst_8 = arith.constant dense<0.000000e+00> : vector<64x128xf32>
    %10 = tpu.matmul %8, %9, %cst_8 {dimension_numbers = #tpu.dot_dimension_numbers<[1], [0], [0], [1], [0, 0, 1, 1], [], []>} : vector<64x128xf32>, vector<128x128xf32>, vector<64x128xf32> -> vector<64x128xf32>
    %c0_9 = arith.constant 0 : index
    %c0_10 = arith.constant 0 : index
    %11 = vector.load %arg5[%c0_9, %c0_10] : memref<1x128xf32, #tpu.memory_space<vmem>>, vector<1x128xf32>
    %12 = vector.broadcast %11 : vector<1x128xf32> to vector<64x128xf32>
    %13 = arith.addf %10, %12 : vector<64x128xf32>
    %cst_11 = arith.constant 0.000000e+00 : f32
    %14 = vector.broadcast %cst_11 : f32 to vector<64x128xf32>
    %15 = arith.maximumf %13, %14 : vector<64x128xf32>
    %c0_12 = arith.constant 0 : index
    %c0_13 = arith.constant 0 : index
    %16 = vector.load %arg6[%c0_12, %c0_13] : memref<128x8xf32, #tpu.memory_space<vmem>>, vector<128x8xf32>
    %cst_14 = arith.constant dense<0.000000e+00> : vector<64x8xf32>
    %17 = tpu.matmul %15, %16, %cst_14 {dimension_numbers = #tpu.dot_dimension_numbers<[1], [0], [0], [1], [0, 0, 1, 1], [], []>} : vector<64x128xf32>, vector<128x8xf32>, vector<64x8xf32> -> vector<64x8xf32>
    %c0_15 = arith.constant 0 : index
    %c0_16 = arith.constant 0 : index
    %18 = vector.load %arg7[%c0_15, %c0_16] : memref<1x8xf32, #tpu.memory_space<vmem>>, vector<1x8xf32>
    %19 = vector.broadcast %18 : vector<1x8xf32> to vector<64x8xf32>
    %20 = arith.addf %17, %19 : vector<64x8xf32>
    %cst_17 = arith.constant 0.000000e+00 : f32
    %21 = vector.broadcast %cst_17 : f32 to vector<64x6xf32>
    %22 = tpu.concatenate %6, %20, %21 in 1 : vector<64x2xf32>, vector<64x8xf32>, vector<64x6xf32> -> vector<64x16xf32>
    %c0_18 = arith.constant 0 : index
    %c0_19 = arith.constant 0 : index
    %23 = vector.load %arg8[%c0_18, %c0_19] : memref<64x16xf32, #tpu.memory_space<vmem>>, vector<64x16xf32>
    tpu.vector_store %arg8[%c0_18, %c0_19], %22 {strides = array<i32>} : memref<64x16xf32, #tpu.memory_space<vmem>>, vector<64x16xf32>,
    return
  }
  func.func @transform_0(%arg0: i32) -> (i32, i32) {
    %c0_i32 = arith.constant 0 : i32
    %c0_i32_0 = arith.constant 0 : i32
    return %arg0, %c0_i32 : i32, i32
  }
  func.func @transform_1(%arg0: i32) -> (i32, i32) {
    %c0_i32 = arith.constant 0 : i32
    %c0_i32_0 = arith.constant 0 : i32
    %c0_i32_1 = arith.constant 0 : i32
    return %c0_i32, %c0_i32_0 : i32, i32
  }
  func.func @transform_2(%arg0: i32) -> (i32, i32) {
    %c0_i32 = arith.constant 0 : i32
    %c0_i32_0 = arith.constant 0 : i32
    %c0_i32_1 = arith.constant 0 : i32
    return %c0_i32, %c0_i32_0 : i32, i32
  }
  func.func @transform_3(%arg0: i32) -> (i32, i32) {
    %c0_i32 = arith.constant 0 : i32
    %c0_i32_0 = arith.constant 0 : i32
    %c0_i32_1 = arith.constant 0 : i32
    return %c0_i32, %c0_i32_0 : i32, i32
  }
  func.func @transform_4(%arg0: i32) -> (i32, i32) {
    %c0_i32 = arith.constant 0 : i32
    %c0_i32_0 = arith.constant 0 : i32
    %c0_i32_1 = arith.constant 0 : i32
    return %c0_i32, %c0_i32_0 : i32, i32
  }
  func.func @transform_5(%arg0: i32) -> (i32, i32) {
    %c0_i32 = arith.constant 0 : i32
    %c0_i32_0 = arith.constant 0 : i32
    %c0_i32_1 = arith.constant 0 : i32
    return %c0_i32, %c0_i32_0 : i32, i32
  }
  func.func @transform_6(%arg0: i32) -> (i32, i32) {
    %c0_i32 = arith.constant 0 : i32
    %c0_i32_0 = arith.constant 0 : i32
    %c0_i32_1 = arith.constant 0 : i32
    return %c0_i32, %c0_i32_0 : i32, i32
  }
  func.func @transform_7(%arg0: i32) -> (i32, i32) {
    %c0_i32 = arith.constant 0 : i32
    %c0_i32_0 = arith.constant 0 : i32
    return %arg0, %c0_i32 : i32, i32
  }
}

</mosaic_0001>

<bundles_post_ra>
// kernel: cam_head_forward.1
= control target key start
LH: loop header
LB: loop body
LE: loop exit
PB: predicated region body
PF: predicated region fallthrough
CT: control target
= control target key end

     0   :  { %s365_s11 = smov 96   ;;  %vm297_vm0 = vcmask 15360   ;;  %vm306_vm1 = vcmask 80896   ;;  %vm315_vm2 = vcmask 130048   ;;  %s640_s1 = inlined_call_operand.vmem [shape: f32[128,128], index: 1, kind: input, shape index: {}]   ;;  %s641_s2 = inlined_call_operand.vmem [shape: f32[1,128], index: 2, kind: input, shape index: {}]   ;;  %s642_s0 = inlined_call_operand.vmem [shape: f32[64,128], index: 0, kind: input, shape index: {}]   ;;  %s643_s3 = inlined_call_operand.vmem [shape: f32[128,128], index: 3, kind: input, shape index: {}]   ;;  %s644_s4 = inlined_call_operand.vmem [shape: f32[1,128], index: 4, kind: input, shape index: {}]   ;;  %s645_s5 = inlined_call_operand.vmem [shape: f32[128,8], index: 5, kind: input, shape index: {}]   ;;  %s646_s6 = inlined_call_operand.vmem [shape: f32[1,8], index: 6, kind: input, shape index: {}]   ;;  %s647_s7 = inlined_call_operand.vmem [shape: f32[64,16], index: 7, kind: output, shape index: {}]  }
   0x1   :  { %v49_v0 = vld [vmem:[%s640_s1 + $0x78] sm:$0xff]  ;;  %v48_v1 = vld [vmem:[%s640_s1 + $0x70] sm:$0xff]  ;;  %v47_v2 = vld [vmem:[%s640_s1 + $0x68] sm:$0xff] }
   0x2   :  { %54 = vmatpush.msra.mxu0 %v49_v0  ;;  %328 = vmatpush.msra.mxu3 %v49_v0  ;;  %v46_v3 = vld [vmem:[%s640_s1 + $0x60] sm:$0xff]  ;;  %v45_v4 = vld [vmem:[%s640_s1 + $0x58] sm:$0xff]  ;;  %v44_v5 = vld [vmem:[%s640_s1 + $0x50] sm:$0xff] }
   0x3   :  { %v43_v6 = vld [vmem:[%s640_s1 + $0x48] sm:$0xff]  ;;  %v42_v7 = vld [vmem:[%s640_s1 + $0x40] sm:$0xff]  ;;  %v41_v8 = vld [vmem:[%s640_s1 + $0x38] sm:$0xff] }
   0x4   :  { %55 = vmatpush.msra.mxu0 %v48_v1  ;;  %329 = vmatpush.msra.mxu3 %v48_v1  ;;  %v40_v9 = vld [vmem:[%s640_s1 + $0x30] sm:$0xff]  ;;  %v39_v10 = vld [vmem:[%s640_s1 + $0x28] sm:$0xff]  ;;  %v38_v11 = vld [vmem:[%s640_s1 + $0x20] sm:$0xff] }
   0x5   :  { %v37_v12 = vld [vmem:[%s640_s1 + $0x18] sm:$0xff]  ;;  %v36_v13 = vld [vmem:[%s640_s1 + $0x10] sm:$0xff]  ;;  %v35_v14 = vld [vmem:[%s640_s1 + $0x8] sm:$0xff] }
   0x6   :  { %56 = vmatpush.msra.mxu0 %v47_v2  ;;  %330 = vmatpush.msra.mxu3 %v47_v2  ;;  %v34_v15 = vld [vmem:[%s640_s1] sm:$0xff]  ;;  %v32_v17 = vld [vmem:[%s642_s0 + $0x30] sm:$0xff]  ;;  %v27_v18 = vld [vmem:[%s642_s0 + $0x8] sm:$0xff]  ;;  %s366_s1 = smov 2  }
   0x7   :  { %v26_v16 = vld [vmem:[%s642_s0] sm:$0xff]  ;;  %v33_v19 = vld [vmem:[%s642_s0 + $0x38] sm:$0xff]  ;;  %v117_v21 = vld [vmem:[%s643_s3 + $0x70] sm:$0xff] }
   0x8   :  { %57 = vmatpush.msra.mxu0 %v46_v3  ;;  %331 = vmatpush.msra.mxu3 %v46_v3  ;;  %v118_v20 = vld [vmem:[%s643_s3 + $0x78] sm:$0xff]  ;;  %v116_v22 = vld [vmem:[%s643_s3 + $0x68] sm:$0xff]  ;;  %v115_v23 = vld [vmem:[%s643_s3 + $0x60] sm:$0xff] }
   0x9   :  { %123 = vmatpush.msra.mxu1 %v118_v20  ;;  %v28_v24 = vld [vmem:[%s642_s0 + $0x10] sm:$0xff]  ;;  %v114_v25 = vld [vmem:[%s643_s3 + $0x58] sm:$0xff]  ;;  %v112_v27 = vld [vmem:[%s643_s3 + $0x48] sm:$0xff] }
   0xa   :  { %58 = vmatpush.msra.mxu0 %v45_v4  ;;  %332 = vmatpush.msra.mxu3 %v45_v4  ;;  %v113_v26 = vld [vmem:[%s643_s3 + $0x50] sm:$0xff]  ;;  %v111_v28 = vld [vmem:[%s643_s3 + $0x40] sm:$0xff]  ;;  %v29_v29 = vld [vmem:[%s642_s0 + $0x18] sm:$0xff] }
   0xb   :  { %124 = vmatpush.msra.mxu1 %v117_v21  ;;  %v110_v30 = vld [vmem:[%s643_s3 + $0x38] sm:$0xff]  ;;  %v109_v31 = vld [vmem:[%s643_s3 + $0x30] sm:$0xff]  ;;  %v108_v32 = vld [vmem:[%s643_s3 + $0x28] sm:$0xff] }
   0xc   :  { %59 = vmatpush.msra.mxu0 %v44_v5  ;;  %333 = vmatpush.msra.mxu3 %v44_v5  ;;  %v107_v33 = vld [vmem:[%s643_s3 + $0x20] sm:$0xff]  ;;  %v106_v35 = vld [vmem:[%s643_s3 + $0x18] sm:$0xff]  ;;  %v31_v36 = vld [vmem:[%s642_s0 + $0x28] sm:$0xff] }
   0xd   :  { %125 = vmatpush.msra.mxu1 %v116_v22  ;;  %v30_v34 = vld [vmem:[%s642_s0 + $0x20] sm:$0xff]  ;;  %v105_v37 = vld [vmem:[%s643_s3 + $0x10] sm:$0xff]  ;;  %v104_v38 = vld [vmem:[%s643_s3 + $0x8] sm:$0xff] }
   0xe   :  { %60 = vmatpush.msra.mxu0 %v43_v6  ;;  %334 = vmatpush.msra.mxu3 %v43_v6  ;;  %v103_v39 = vld [vmem:[%s643_s3] sm:$0xff]  ;;  %v187_v55 = vld [vmem:[%s645_s5 + $0x78] sm:$0xff]  ;;  %v186_v56 = vld [vmem:[%s645_s5 + $0x70] sm:$0xff] }
   0xf   :  { %126 = vmatpush.msra.mxu1 %v115_v23  ;;  %v362_v40 = vld [vmem:[%s641_s2] ss:$0 sm:$0xff]  ;;  %192 = vmatpush.msra.mxu2 %v187_v55  ;;  %v185_v57 = vld [vmem:[%s645_s5 + $0x68] sm:$0xff]  ;;  %v183_v62 = vld [vmem:[%s645_s5 + $0x58] sm:$0xff] }
  0x10   :  { %61 = vmatpush.msra.mxu0 %v42_v7  ;;  %335 = vmatpush.msra.mxu3 %v42_v7  ;;  %v184_v60 = vld [vmem:[%s645_s5 + $0x60] sm:$0xff]  ;;  %v182_v63 = vld [vmem:[%s645_s5 + $0x50] sm:$0xff]  ;;  %v181_v0 = vld [vmem:[%s645_s5 + $0x48] sm:$0xff] }
  0x11   :  { %127 = vmatpush.msra.mxu1 %v114_v25  ;;  %193 = vmatpush.msra.mxu2 %v186_v56 }
  0x12   :  { %62 = vmatpush.msra.mxu0 %v41_v8  ;;  %336 = vmatpush.msra.mxu3 %v41_v8  ;;  %v180_v8 = vld [vmem:[%s645_s5 + $0x40] sm:$0xff] }
  0x13   :  { %128 = vmatpush.msra.mxu1 %v113_v26  ;;  %194 = vmatpush.msra.mxu2 %v185_v57 }
  0x14   :  { %63 = vmatpush.msra.mxu0 %v40_v9  ;;  %337 = vmatpush.msra.mxu3 %v40_v9  ;;  %v179_v9 = vld [vmem:[%s645_s5 + $0x38] sm:$0xff] }
  0x15   :  { %129 = vmatpush.msra.mxu1 %v112_v27  ;;  %195 = vmatpush.msra.mxu2 %v184_v60 }
  0x16   :  { %64 = vmatpush.msra.mxu0 %v39_v10  ;;  %338 = vmatpush.msra.mxu3 %v39_v10  ;;  %v178_v10 = vld [vmem:[%s645_s5 + $0x30] sm:$0xff] }
  0x17   :  { %130 = vmatpush.msra.mxu1 %v111_v28  ;;  %196 = vmatpush.msra.mxu2 %v183_v62 }
  0x18   :  { %65 = vmatpush.msra.mxu0 %v38_v11  ;;  %339 = vmatpush.msra.mxu3 %v38_v11  ;;  %v177_v11 = vld [vmem:[%s645_s5 + $0x28] sm:$0xff] }
  0x19   :  { %131 = vmatpush.msra.mxu1 %v110_v30  ;;  %197 = vmatpush.msra.mxu2 %v182_v63 }
  0x1a   :  { %66 = vmatpush.msra.mxu0 %v37_v12  ;;  %340 = vmatpush.msra.mxu3 %v37_v12  ;;  %v176_v12 = vld [vmem:[%s645_s5 + $0x20] sm:$0xff] }
  0x1b   :  { %132 = vmatpush.msra.mxu1 %v109_v31  ;;  %198 = vmatpush.msra.mxu2 %v181_v0 }
  0x1c   :  { %67 = vmatpush.msra.mxu0 %v36_v13  ;;  %341 = vmatpush.msra.mxu3 %v36_v13  ;;  %v175_v13 = vld [vmem:[%s645_s5 + $0x18] sm:$0xff] }
  0x1d   :  { %133 = vmatpush.msra.mxu1 %v108_v32  ;;  %199 = vmatpush.msra.mxu2 %v180_v8 }
  0x1e   :  { %68 = vmatpush.msra.mxu0 %v35_v14  ;;  %342 = vmatpush.msra.mxu3 %v35_v14  ;;  %v174_v14 = vld [vmem:[%s645_s5 + $0x10] sm:$0xff] }
  0x1f   :  { %134 = vmatpush.msra.mxu1 %v107_v33  ;;  %200 = vmatpush.msra.mxu2 %v179_v9 }
  0x20   :  { %69 = vmatpush.msra.mxu0 %v34_v15  ;;  %343 = vmatpush.msra.mxu3 %v34_v15  ;;  %v173_v15 = vld [vmem:[%s645_s5 + $0x8] sm:$0xff] }
  0x21   :  { %70 = vmatmul.f32.vlgmr.msra.gmra.mxu0 %v26_v16  ;;  %88 = vmatmul.f32.vlgmr.msra.gmra.mxu3 %v32_v17  ;;  %v172_v16 = vld [vmem:[%s645_s5] sm:$0xff] }
  0x22   :  { %344 = vmatpush.msrb.mxu3 %v118_v20  ;;  %135 = vmatpush.msra.mxu1 %v106_v35  ;;  %v363_v17 = vld [vmem:[%s644_s4] ss:$0 sm:$0xff] }
  0x23   :  { %201 = vmatpush.msra.mxu2 %v178_v10 }
  0x24   :  { %345 = vmatpush.msrb.mxu3 %v117_v21  ;;  %136 = vmatpush.msra.mxu1 %v105_v37 }
  0x25   :  { %202 = vmatpush.msra.mxu2 %v177_v11 }
  0x26   :  { %346 = vmatpush.msrb.mxu3 %v116_v22  ;;  %137 = vmatpush.msra.mxu1 %v104_v38 }
  0x27   :  { %203 = vmatpush.msra.mxu2 %v176_v12 }
  0x28   :  { %347 = vmatpush.msrb.mxu3 %v115_v23  ;;  %138 = vmatpush.msra.mxu1 %v103_v39 }
  0x29   :  { %73 = vmatmul.f32.gmra.mxu0 %v27_v18  ;;  %91 = vmatmul.f32.gmra.mxu3 %v33_v19 }
  0x2a   :  { %348 = vmatpush.msrb.mxu3 %v114_v25  ;;  %204 = vmatpush.msra.mxu2 %v175_v13 }
  0x2c   :  { %349 = vmatpush.msrb.mxu3 %v113_v26  ;;  %205 = vmatpush.msra.mxu2 %v174_v14 }
  0x2e   :  { %350 = vmatpush.msrb.mxu3 %v112_v27  ;;  %206 = vmatpush.msra.mxu2 %v173_v15 }
  0x30   :  { %351 = vmatpush.msrb.mxu3 %v111_v28  ;;  %207 = vmatpush.msra.mxu2 %v172_v16 }
  0x31   :  { %76 = vmatmul.f32.gmra.mxu0 %v28_v24 }
  0x32   :  { %352 = vmatpush.msrb.mxu3 %v110_v30 }
  0x34   :  { %353 = vmatpush.msrb.mxu3 %v109_v31 }
  0x36   :  { %354 = vmatpush.msrb.mxu3 %v108_v32 }
  0x38   :  { %355 = vmatpush.msrb.mxu3 %v107_v33 }
  0x39   :  { %79 = vmatmul.f32.gmra.mxu0 %v29_v29 }
  0x3a   :  { %356 = vmatpush.msrb.mxu3 %v106_v35 }
  0x3c   :  { %357 = vmatpush.msrb.mxu3 %v105_v37 }
  0x3e   :  { %358 = vmatpush.msrb.mxu3 %v104_v38 }
  0x40   :  { %359 = vmatpush.msrb.mxu3 %v103_v39 }
  0x41   :  { %82 = vmatmul.f32.gmra.mxu0 %v30_v34 }
  0x49   :  { %85 = vmatmul.f32.gmra.mxu0 %v31_v36 }
  0x9e   :  { %v71_v41 = vpop.f32.mrf.mxu0 }
  0x9f   :  { %v72_v42 = vadd.f32 %v362_v40, %v71_v41 }
  0xa1   :  { %241 = vrot.lane.b32.xlu0 %v72_v42, %s365_s11  ;;  %v95_v43 = vmax.f32 %v72_v42, 0.0  ;;  %v364_v42 = vld [vmem:[%s646_s6] ss:$0 sm:$0xff] }
  0xa3   :  { %139 = vmatmul.f32.vlgmr.msra.gmra.mxu1 %v95_v43 }
  0xa4   :  { %v89_v44 = vpop.f32.mrf.mxu3 }
  0xa5   :  { %v90_v45 = vadd.f32 %v362_v40, %v89_v44 }
  0xa6   :  { %v74_v46 = vpop.f32.mrf.mxu0 }
  0xa7   :  { %v75_v47 = vadd.f32 %v362_v40, %v74_v46  ;;  %v101_v7 = vmax.f32 %v90_v45, 0.0 }
  0xa9   :  { %253 = vrot.lane.b32.xlu0 %v90_v45, %s365_s11  ;;  %v96_v48 = vmax.f32 %v75_v47, 0.0 }
  0xab   :  { %142 = vmatmul.f32.gmra.mxu1 %v96_v48 }
  0xac   :  { %v92_v49 = vpop.f32.mrf.mxu3 }
  0xad   :  { %v93_v50 = vadd.f32 %v362_v40, %v92_v49 }
  0xae   :  { %v77_v51 = vpop.f32.mrf.mxu0 }
  0xaf   :  { %v102_v52 = vmax.f32 %v93_v50, 0.0  ;;  %v78_v53 = vadd.f32 %v362_v40, %v77_v51  ;;  %255 = vrot.lane.b32.xlu1 %v93_v50, %s365_s11 }
  0xb1   :  { %243 = vrot.lane.b32.xlu0 %v75_v47, %s365_s11  ;;  %v97_v54 = vmax.f32 %v78_v53, 0.0  ;;  %160 = vmatmul.f32.vlgmr.msrb.gmra.mxu3 %v102_v52 }
  0xb3   :  { %145 = vmatmul.f32.gmra.mxu1 %v97_v54 }
  0xb6   :  { %v80_v58 = vpop.f32.mrf.mxu0 }
  0xb7   :  { %v81_v59 = vadd.f32 %v362_v40, %v80_v58  ;;  %245 = vrot.lane.b32.xlu1 %v78_v53, %s365_s11 }
  0xb9   :  { %v98_v61 = vmax.f32 %v81_v59, 0.0 }
  0xbb   :  { %148 = vmatmul.f32.gmra.mxu1 %v98_v61 }
  0xbe   :  { %v83_v1 = vpop.f32.mrf.mxu0 }
  0xbf   :  { %v84_v2 = vadd.f32 %v362_v40, %v83_v1  ;;  %247 = vrot.lane.b32.xlu1 %v81_v59, %s365_s11 }
  0xc1   :  { %249 = vrot.lane.b32.xlu2 %v84_v2, %s365_s11  ;;  %v99_v3 = vmax.f32 %v84_v2, 0.0 }
  0xc3   :  { %151 = vmatmul.f32.gmra.mxu1 %v99_v3 }
  0xc6   :  { %v86_v4 = vpop.f32.mrf.mxu0 }
  0xc7   :  { %v87_v5 = vadd.f32 %v362_v40, %v86_v4 }
  0xc9   :  { %251 = vrot.lane.b32.xlu2 %v87_v5, %s365_s11  ;;  %v100_v6 = vmax.f32 %v87_v5, 0.0 }
  0xcb   :  { %154 = vmatmul.f32.gmra.mxu1 %v100_v6 }
  0xd3   :  { %157 = vmatmul.f32.gmra.mxu1 %v101_v7 }
 0x113   :  { %v242_v61 = vpop.permute.xlu0 %241 }
 0x11b   :  { %v250_v59 = vpop.permute.xlu2 %249  ;;  %v254_v2 = vpop.permute.xlu0 %253 }
 0x120   :  { %v140_v18 = vpop.f32.mrf.mxu1 }
 0x121   :  { %v141_v19 = vadd.f32 %v363_v17, %v140_v18  ;;  %v256_v1 = vpop.permute.xlu1 %255 }
 0x123   :  { %v164_v20 = vmax.f32 %v141_v19, 0.0  ;;  %v252_v60 = vpop.permute.xlu2 %251  ;;  %v244_v4 = vpop.permute.xlu0 %243 }
 0x125   :  { %208 = vmatmul.f32.vlgmr.msra.gmra.mxu2 %v164_v20 }
 0x128   :  { %v143_v21 = vpop.f32.mrf.mxu1 }
 0x129   :  { %v144_v22 = vadd.f32 %v363_v17, %v143_v21  ;;  %v246_v3 = vpop.permute.xlu1 %245 }
 0x12b   :  { %v165_v23 = vmax.f32 %v144_v22, 0.0 }
 0x12d   :  { %211 = vmatmul.f32.gmra.mxu2 %v165_v23 }
 0x130   :  { %v146_v24 = vpop.f32.mrf.mxu1 }
 0x131   :  { %v147_v25 = vadd.f32 %v363_v17, %v146_v24  ;;  %v248_v5 = vpop.permute.xlu1 %247 }
 0x133   :  { %v166_v26 = vmax.f32 %v147_v25, 0.0 }
 0x134   :  { %v161_v38 = vpop.f32.mrf.mxu3 }
 0x135   :  { %214 = vmatmul.f32.gmra.mxu2 %v166_v26  ;;  %v162_v40 = vadd.f32 %v363_v17, %v161_v38 }
 0x137   :  { %v171_v41 = vmax.f32 %v162_v40, 0.0 }
 0x138   :  { %v149_v27 = vpop.f32.mrf.mxu1 }
 0x139   :  { %v150_v28 = vadd.f32 %v363_v17, %v149_v27 }
 0x13b   :  { %v167_v29 = vmax.f32 %v150_v28, 0.0 }
 0x13d   :  { %217 = vmatmul.f32.gmra.mxu2 %v167_v29 }
 0x140   :  { %v152_v30 = vpop.f32.mrf.mxu1 }
 0x141   :  { %v153_v31 = vadd.f32 %v363_v17, %v152_v30 }
 0x143   :  { %v168_v32 = vmax.f32 %v153_v31, 0.0 }
 0x145   :  { %220 = vmatmul.f32.gmra.mxu2 %v168_v32 }
 0x148   :  { %v155_v33 = vpop.f32.mrf.mxu1 }
 0x149   :  { %v156_v34 = vadd.f32 %v363_v17, %v155_v33 }
 0x14b   :  { %v169_v35 = vmax.f32 %v156_v34, 0.0 }
 0x14d   :  { %223 = vmatmul.f32.gmra.mxu2 %v169_v35 }
 0x150   :  { %v158_v36 = vpop.f32.mrf.mxu1 }
 0x151   :  { %v159_v37 = vadd.f32 %v363_v17, %v158_v36 }
 0x153   :  { %v170_v39 = vmax.f32 %v159_v37, 0.0 }
 0x155   :  { %226 = vmatmul.f32.gmra.mxu2 %v170_v39 }
 0x15d   :  { %229 = vmatmul.f32.gmra.mxu2 %v171_v41 }
 0x1a8   :  { %v209_v43 = vpop.f32.mrf.mxu2 }
 0x1a9   :  { %v210_v44 = vadd.f32 %v364_v42, %v209_v43 }
 0x1ab   :  { %273 = vrot.lane.b32.xlu2 %v210_v44, %s366_s1 }
 0x1b0   :  { %v212_v45 = vpop.f32.mrf.mxu2 }
 0x1b1   :  { %v213_v46 = vadd.f32 %v364_v42, %v212_v45 }
 0x1b3   :  { %275 = vrot.lane.b32.xlu0 %v213_v46, %s366_s1 }
 0x1b8   :  { %v215_v47 = vpop.f32.mrf.mxu2 }
 0x1b9   :  { %v216_v48 = vadd.f32 %v364_v42, %v215_v47 }
 0x1bb   :  { %277 = vrot.lane.b32.xlu1 %v216_v48, %s366_s1 }
 0x1c0   :  { %v218_v49 = vpop.f32.mrf.mxu2 }
 0x1c1   :  { %v219_v50 = vadd.f32 %v364_v42, %v218_v49 }
 0x1c3   :  { %279 = vrot.lane.b32.xlu2 %v219_v50, %s366_s1 }
 0x1c8   :  { %v221_v51 = vpop.f32.mrf.mxu2 }
 0x1c9   :  { %v222_v52 = vadd.f32 %v364_v42, %v221_v51 }
 0x1cb   :  { %281 = vrot.lane.b32.xlu0 %v222_v52, %s366_s1 }
 0x1d0   :  { %v224_v53 = vpop.f32.mrf.mxu2 }
 0x1d1   :  { %v225_v54 = vadd.f32 %v364_v42, %v224_v53 }
 0x1d3   :  { %283 = vrot.lane.b32.xlu1 %v225_v54, %s366_s1 }
 0x1d8   :  { %v227_v55 = vpop.f32.mrf.mxu2 }
 0x1d9   :  { %v228_v56 = vadd.f32 %v364_v42, %v227_v55 }
 0x1db   :  { %285 = vrot.lane.b32.xlu2 %v228_v56, %s366_s1 }
 0x1e0   :  { %v230_v57 = vpop.f32.mrf.mxu2 }
 0x1e1   :  { %v231_v58 = vadd.f32 %v364_v42, %v230_v57 }
 0x1e3   :  { %287 = vrot.lane.b32.xlu0 %v231_v58, %s366_s1 }
 0x205   :  { %v274_v62 = vpop.permute.xlu2 %273 }
 0x206   :  { %v298_v63 = vsel %vm297_vm0, %v242_v61, %v274_v62 }
 0x207   :  { %v307_v0 = vsel %vm306_vm1, %v298_v63, 0.0 }
 0x208   :  { %316 = vst.msk [vmem:[%s647_s7] sm:$0xff] %vm315_vm2, %v307_v0 }
 0x21d   :  { %v280_v6 = vpop.permute.xlu2 %279 }
 0x21e   :  { %v301_v7 = vsel %vm297_vm0, %v248_v5, %v280_v6 }
 0x21f   :  { %v310_v8 = vsel %vm306_vm1, %v301_v7, 0.0 }
 0x220   :  { %319 = vst.msk [vmem:[%s647_s7 + $0x18] sm:$0xff] %vm315_vm2, %v310_v8 }
 0x225   :  { %v276_v9 = vpop.permute.xlu0 %275 }
 0x226   :  { %v299_v10 = vsel %vm297_vm0, %v244_v4, %v276_v9 }
 0x227   :  { %v308_v11 = vsel %vm306_vm1, %v299_v10, 0.0 }
 0x228   :  { %317 = vst.msk [vmem:[%s647_s7 + $0x8] sm:$0xff] %vm315_vm2, %v308_v11 }
 0x22d   :  { %v278_v12 = vpop.permute.xlu1 %277 }
 0x22e   :  { %v300_v13 = vsel %vm297_vm0, %v246_v3, %v278_v12 }
 0x22f   :  { %v309_v14 = vsel %vm306_vm1, %v300_v13, 0.0 }
 0x230   :  { %318 = vst.msk [vmem:[%s647_s7 + $0x10] sm:$0xff] %vm315_vm2, %v309_v14 }
 0x235   :  { %v286_v15 = vpop.permute.xlu2 %285 }
 0x236   :  { %v304_v16 = vsel %vm297_vm0, %v254_v2, %v286_v15 }
 0x237   :  { %v313_v17 = vsel %vm306_vm1, %v304_v16, 0.0 }
 0x238   :  { %322 = vst.msk [vmem:[%s647_s7 + $0x30] sm:$0xff] %vm315_vm2, %v313_v17 }
 0x23d   :  { %v282_v18 = vpop.permute.xlu0 %281 }
 0x23e   :  { %v302_v19 = vsel %vm297_vm0, %v250_v59, %v282_v18 }
 0x23f   :  { %v311_v20 = vsel %vm306_vm1, %v302_v19, 0.0 }
 0x240   :  { %320 = vst.msk [vmem:[%s647_s7 + $0x20] sm:$0xff] %vm315_vm2, %v311_v20 }
 0x245   :  { %v284_v21 = vpop.permute.xlu1 %283 }
 0x246   :  { %v303_v22 = vsel %vm297_vm0, %v252_v60, %v284_v21 }
 0x247   :  { %v312_v23 = vsel %vm306_vm1, %v303_v22, 0.0 }
 0x248   :  { %321 = vst.msk [vmem:[%s647_s7 + $0x28] sm:$0xff] %vm315_vm2, %v312_v23 }
 0x255   :  { %v288_v24 = vpop.permute.xlu0 %287 }
 0x256   :  { %v305_v25 = vsel %vm297_vm0, %v256_v1, %v288_v24 }
 0x257   :  { %v314_v26 = vsel %vm306_vm1, %v305_v25, 0.0 }
 0x258   :  { %323 = vst.msk [vmem:[%s647_s7 + $0x38] sm:$0xff] %vm315_vm2, %v314_v26 }

</bundles_post_ra>
